<compile_context>
chip_gen: v6e
topology: v6e:2x2x1
jax: 0.10.0
libtpu: 0.0.40
codegen_flags: <defaults>
</compile_context>

<pallas_src>
import functools

import jax
import jax.numpy as jnp
from jax import lax
from jax.experimental import pallas as pl
from jax.experimental.pallas import tpu as pltpu


def _round_up(x, m):
    return m * ((x + m - 1) // m)


# ----------------------------------------------------------------------------
# Kernel body
# ----------------------------------------------------------------------------
def _span_pred_kernel(x_ref, w1_ref, b1_ref, g_ref, beta_ref, w2_ref, b2_ref,
                      o_ref, *, eps, mxu_dtype):
    # In-VMEM cast of the activation tile (one cheap VPU pass; x is read from
    # HBM in its native dtype so we do not pay a separate wrapper cast pass).
    x = x_ref[...].astype(mxu_dtype)

    # Linear 1 (hidden -> hidden), f32 accumulation on the MXU.
    h = jnp.dot(x, w1_ref[...], preferred_element_type=jnp.float32)
    h = h + b1_ref[...]
    # ReLU (VPU, f32).
    h = jnp.maximum(h, 0.0)

    # BertLayerNorm over the hidden axis, eps=1e-12, biased variance, f32.
    # Single-pass moments: var = E[h^2] - mean^2 (XLU reductions), then one
    # per-row affine (h*inv - mean*inv) before the gamma/beta pass.
    hdim = h.shape[-1]
    s1 = jnp.sum(h, axis=-1, keepdims=True)
    s2 = jnp.sum(h * h, axis=-1, keepdims=True)
    mean = s1 * (1.0 / hdim)
    var = s2 * (1.0 / hdim) - mean * mean
    inv = lax.rsqrt(var + eps)                      # EUP slot
    hn = (h * inv - mean * inv) * g_ref[...] + beta_ref[...]

    # (Dropout = identity in eval mode.)

    # Linear 2 (hidden -> padded class_size), lane-dense output store.
    out = jnp.dot(hn.astype(mxu_dtype), w2_ref[...],
                  preferred_element_type=jnp.float32)
    o_ref[...] = (out + b2_ref[...]).astype(o_ref.dtype)


# ----------------------------------------------------------------------------
# Capability / hardware probes (cached, run once per process)
# ----------------------------------------------------------------------------
@functools.lru_cache(maxsize=1)
def _buffered_weights_supported():
    """One-time probe: can grid-invariant operands use pl.Buffered(1)?"""
    if not hasattr(pl, "Buffered"):
        return False

    def k(w_ref, x_ref, o_ref):
        o_ref[...] = x_ref[...] + w_ref[...]

    try:
        w = jnp.zeros((8, 128), jnp.float32)
        x = jnp.zeros((16, 128), jnp.float32)
        out = pl.pallas_call(
            k,
            out_shape=jax.ShapeDtypeStruct((16, 128), jnp.float32),
            grid=(2,),
            in_specs=[
                pl.BlockSpec((8, 128), lambda i: (0, 0),
                             pipeline_mode=pl.Buffered(1)),
                pl.BlockSpec((8, 128), lambda i: (i, 0)),
            ],
            out_specs=pl.BlockSpec((8, 128), lambda i: (i, 0)),
        )(w, x)
        jax.block_until_ready(out)
        return True
    except Exception:
        return False


@functools.lru_cache(maxsize=1)
def _vmem_cap_bytes():
    """~0.78 of the chip's VMEM (leaves headroom for compiler scratch)."""
    cap = 64 << 20  # conservative default: v7x per-TensorCore VMEM
    try:
        info = pltpu.get_tpu_info()
        cap = int(getattr(info, "vmem_capacity_bytes", cap))
    except Exception:
        pass
    return int(0.78 * cap)


def _vmem_limit_bytes(row_tile, h, c_pad, mxu_itemsize, single_buffer):
    # x tile is resident in its HBM dtype (f32 assumed worst case) and the
    # output tile in f32, both double-buffered by the pipeline.
    tiles = 2 * row_tile * h * 4 + 2 * row_tile * c_pad * 4
    wbuf = 1 if single_buffer else 2
    weights = wbuf * ((h * h + h * c_pad) * mxu_itemsize + (3 * h + c_pad) * 4)
    # in-kernel intermediates: bf16 x copy + f32 h/hn + f32 out.
    scratch = row_tile * h * (mxu_itemsize + 2 * 4) + row_tile * c_pad * 4
    est = int(1.25 * (tiles + weights + scratch)) + (2 << 20)
    return max(32 << 20, min(est, _vmem_cap_bytes()))


# ----------------------------------------------------------------------------
# One-time parameter prep (call at model load, NOT per forward)
# ----------------------------------------------------------------------------
def prepare_span_prediction_params(w1, b1, gamma, beta, w2, b2, *,
                                   use_bf16=True):
    """Weights are (in_features, out_features), i.e. the transpose of the
    PyTorch nn.Linear .weight.  Pads the class dim to a multiple of 128
    (lane-dense output stores) and casts MXU operands once."""
    h = w1.shape[0]
    c = w2.shape[1]
    c_pad = 128 * pl.cdiv(c, 128)
    mxu_dtype = jnp.bfloat16 if use_bf16 else jnp.float32

    w2_p = jnp.pad(w2, ((0, 0), (0, c_pad - c))) if c_pad != c else w2
    b2_p = jnp.pad(b2, ((0, c_pad - c),)) if c_pad != c else b2

    return dict(
        w1=w1.astype(mxu_dtype),
        b1=b1.reshape(1, h).astype(jnp.float32),
        gamma=gamma.reshape(1, h).astype(jnp.float32),
        beta=beta.reshape(1, h).astype(jnp.float32),
        w2=w2_p.astype(mxu_dtype),
        b2=b2_p.reshape(1, c_pad).astype(jnp.float32),
        h=h, c=c, c_pad=c_pad, mxu_dtype=mxu_dtype,
    )


def _make_specs(row_tile, h, c_pad, single_buffer):
    def inv_spec(shape):
        # Grid-invariant operand: constant index_map; single buffer when the
        # backend supports pl.Buffered (saves the 2x VMEM reservation).
        if single_buffer:
            return pl.BlockSpec(shape, lambda i: (0,) * len(shape),
                                pipeline_mode=pl.Buffered(1))
        return pl.BlockSpec(shape, lambda i: (0,) * len(shape))

    in_specs = [
        pl.BlockSpec((row_tile, h), lambda i: (i, 0)),  # x row-tile
        inv_spec((h, h)),       # w1
        inv_spec((1, h)),       # b1
        inv_spec((1, h)),       # gamma
        inv_spec((1, h)),       # beta
        inv_spec((h, c_pad)),   # w2 (class dim padded to 128 lanes)
        inv_spec((1, c_pad)),   # b2
    ]
    out_specs = pl.BlockSpec((row_tile, c_pad), lambda i: (i, 0))
    return in_specs, out_specs


# ----------------------------------------------------------------------------
# Forward
# ----------------------------------------------------------------------------
def span_prediction_forward(x, params, *, eps=1e-12, row_tile=512,
                            single_buffer_weights=True):
    """x: (..., H) float32 (or bf16); params from
    prepare_span_prediction_params.  Returns (..., C) float32."""
    lead_shape = x.shape[:-1]
    h, c, c_pad = params["h"], params["c"], params["c_pad"]
    assert x.shape[-1] == h

    x2 = x.reshape(-1, h)
    n = x2.shape[0]

    # Row tile: big tiles for large N (amortize ~0.35us/step), clamped to n
    # for small N (no wasted MXU/LN work), then halved until >= 2 grid steps
    # so a v7x megacore can shard the parallel axis across both TensorCores.
    rt = _round_up(max(8, min(row_tile, _round_up(n, 8))), 8)
    while pl.cdiv(n, rt) < 2 and rt > 8:
        rt = _round_up(rt // 2, 8)

    # No wrapper-side row padding: ragged last block is clipped by Pallas
    # (garbage rows only exist in stores that fall outside (n, c_pad)).
    grid = (pl.cdiv(n, rt),)

    single_buffer = single_buffer_weights and _buffered_weights_supported()
    in_specs, out_specs = _make_specs(rt, h, c_pad, single_buffer)
    mxu_itemsize = jnp.dtype(params["mxu_dtype"]).itemsize
    vmem_limit = _vmem_limit_bytes(rt, h, c_pad, mxu_itemsize, single_buffer)

    kernel = functools.partial(_span_pred_kernel, eps=eps,
                               mxu_dtype=params["mxu_dtype"])

    out_p = pl.pallas_call(
        kernel,
        out_shape=jax.ShapeDtypeStruct((n, c_pad), jnp.float32),
        grid_spec=pltpu.PrefetchScalarGridSpec(
            num_scalar_prefetch=0,
            grid=grid,
            in_specs=in_specs,
            out_specs=out_specs,
        ),
        compiler_params=pltpu.CompilerParams(
            dimension_semantics=("parallel",),
            vmem_limit_bytes=vmem_limit),
    )(x2, params["w1"], params["b1"], params["gamma"], params["beta"],
      params["w2"], params["b2"])

    out = out_p[:, :c] if c_pad != c else out_p
    return out.reshape(*lead_shape, c)


# ----------------------------------------------------------------------------
# Reference + self-test
# ----------------------------------------------------------------------------
def _reference(x, w1, b1, gamma, beta, w2, b2, eps=1e-12):
    h = jnp.maximum(x @ w1 + b1, 0.0)
    mean = h.mean(-1, keepdims=True)
    var = ((h - mean) ** 2).mean(-1, keepdims=True)
    hn = (h - mean) / jnp.sqrt(var + eps) * gamma + beta
    return hn @ w2 + b2


if __name__ == "__main__":
    batch, seq, hidden, class_size = 2, 8, 32, 4
    key = jax.random.PRNGKey(0)
    kx, k1, k2, k3, k4 = jax.random.split(key, 5)

    # Deterministic synthetic parameters (shapes from the module __init__).
    x = jax.random.normal(kx, (batch, seq, hidden), dtype=jnp.float32)
    w1 = jax.random.normal(k1, (hidden, hidden), dtype=jnp.float32) * 0.05
    b1 = jax.random.normal(k2, (hidden,), dtype=jnp.float32) * 0.05
    gamma = jnp.ones((hidden,), dtype=jnp.float32)
    beta = jnp.zeros((hidden,), dtype=jnp.float32)
    w2 = jax.random.normal(k3, (hidden, class_size), dtype=jnp.float32) * 0.05
    b2 = jax.random.normal(k4, (class_size,), dtype=jnp.float32) * 0.05

    ref = _reference(x.reshape(-1, hidden), w1, b1, gamma, beta, w2, b2)
    ref = ref.reshape(batch, seq, class_size)

    # Exact-ish path (f32 MXU operands): tight tolerance.
    params_f32 = prepare_span_prediction_params(w1, b1, gamma, beta, w2, b2,
                                                use_bf16=False)
    out_f32 = span_prediction_forward(x, params_f32)
    jax.block_until_ready(out_f32)
    assert out_f32.shape == (batch, seq, class_size)
    assert jnp.allclose(out_f32, ref, atol=1e-4, rtol=1e-4), \
        "f32 kernel mismatch vs reference"

    # Fast path (bf16 MXU operands, f32 accumulation): looser tolerance.
    params_bf16 = prepare_span_prediction_params(w1, b1, gamma, beta, w2, b2,
                                                 use_bf16=True)
    out_bf16 = span_prediction_forward(x, params_bf16)
    jax.block_until_ready(out_bf16)
    assert out_bf16.shape == (batch, seq, class_size)
    assert jnp.allclose(out_bf16, ref, atol=3e-2, rtol=3e-2), \
        "bf16 kernel mismatch vs reference"

    print("KERNEL_OK")
</pallas_src>

<mosaic_0001>
module attributes {stable_mosaic.version = 11 : i64} {
  func.func @k(%arg0: i32, %arg1: memref<8x128xf32, #tpu.memory_space<vmem>>, %arg2: memref<8x128xf32, #tpu.memory_space<vmem>>, %arg3: memref<8x128xf32, #tpu.memory_space<vmem>>) attributes {dimension_semantics = [#tpu.dimension_semantics<arbitrary>], iteration_bounds = array<i64: 2>, scalar_prefetch = 0 : i64, scratch_operands = 0 : i64, tpu.core_type = #tpu.core_type<tc>, window_params = [{pipeline_mode = #tpu.pipeline_mode<synchronous>, transform_indices = @transform_0, window_bounds = array<i64: 8, 128>}, {transform_indices = @transform_1, window_bounds = array<i64: 8, 128>}, {transform_indices = @transform_2, window_bounds = array<i64: 8, 128>}]} {
    %c0 = arith.constant 0 : index
    %c0_0 = arith.constant 0 : index
    %0 = vector.load %arg2[%c0, %c0_0] : memref<8x128xf32, #tpu.memory_space<vmem>>, vector<8x128xf32>
    %c0_1 = arith.constant 0 : index
    %c0_2 = arith.constant 0 : index
    %1 = vector.load %arg1[%c0_1, %c0_2] : memref<8x128xf32, #tpu.memory_space<vmem>>, vector<8x128xf32>
    %2 = arith.addf %0, %1 : vector<8x128xf32>
    %c0_3 = arith.constant 0 : index
    %c0_4 = arith.constant 0 : index
    %3 = vector.load %arg3[%c0_3, %c0_4] : memref<8x128xf32, #tpu.memory_space<vmem>>, vector<8x128xf32>
    tpu.vector_store %arg3[%c0_3, %c0_4], %2 {strides = array<i32>} : memref<8x128xf32, #tpu.memory_space<vmem>>, vector<8x128xf32>,
    return
  }
  func.func @transform_0(%arg0: i32) -> (i32, i32) {
    %c0_i32 = arith.constant 0 : i32
    %c0_i32_0 = arith.constant 0 : i32
    %c0_i32_1 = arith.constant 0 : i32
    return %c0_i32, %c0_i32_0 : i32, i32
  }
  func.func @transform_1(%arg0: i32) -> (i32, i32) {
    %c0_i32 = arith.constant 0 : i32
    %c0_i32_0 = arith.constant 0 : i32
    return %arg0, %c0_i32 : i32, i32
  }
  func.func @transform_2(%arg0: i32) -> (i32, i32) {
    %c0_i32 = arith.constant 0 : i32
    %c0_i32_0 = arith.constant 0 : i32
    return %arg0, %c0_i32 : i32, i32
  }
}

module attributes {stable_mosaic.version = 11 : i64} {
  func.func @_span_pred_kernel(%arg0: i32, %arg1: memref<8x32xf32, #tpu.memory_space<vmem>>, %arg2: memref<32x32xf32, #tpu.memory_space<vmem>>, %arg3: memref<1x32xf32, #tpu.memory_space<vmem>>, %arg4: memref<1x32xf32, #tpu.memory_space<vmem>>, %arg5: memref<1x32xf32, #tpu.memory_space<vmem>>, %arg6: memref<32x128xf32, #tpu.memory_space<vmem>>, %arg7: memref<1x128xf32, #tpu.memory_space<vmem>>, %arg8: memref<8x128xf32, #tpu.memory_space<vmem>>) attributes {dimension_semantics = [#tpu.dimension_semantics<parallel>], iteration_bounds = array<i64: 2>, scalar_prefetch = 0 : i64, scratch_operands = 0 : i64, tpu.core_type = #tpu.core_type<tc>, window_params = [{transform_indices = @transform_0, window_bounds = array<i64: 8, 32>}, {pipeline_mode = #tpu.pipeline_mode<synchronous>, transform_indices = @transform_1, window_bounds = array<i64: 32, 32>}, {pipeline_mode = #tpu.pipeline_mode<synchronous>, transform_indices = @transform_2, window_bounds = array<i64: 1, 32>}, {pipeline_mode = #tpu.pipeline_mode<synchronous>, transform_indices = @transform_3, window_bounds = array<i64: 1, 32>}, {pipeline_mode = #tpu.pipeline_mode<synchronous>, transform_indices = @transform_4, window_bounds = array<i64: 1, 32>}, {pipeline_mode = #tpu.pipeline_mode<synchronous>, transform_indices = @transform_5, window_bounds = array<i64: 32, 128>}, {pipeline_mode = #tpu.pipeline_mode<synchronous>, transform_indices = @transform_6, window_bounds = array<i64: 1, 128>}, {transform_indices = @transform_7, window_bounds = array<i64: 8, 128>}]} {
    %c0 = arith.constant 0 : index
    %c0_0 = arith.constant 0 : index
    %0 = vector.load %arg1[%c0, %c0_0] : memref<8x32xf32, #tpu.memory_space<vmem>>, vector<8x32xf32>
    %c0_1 = arith.constant 0 : index
    %c0_2 = arith.constant 0 : index
    %1 = vector.load %arg2[%c0_1, %c0_2] : memref<32x32xf32, #tpu.memory_space<vmem>>, vector<32x32xf32>
    %cst = arith.constant dense<0.000000e+00> : vector<8x32xf32>
    %2 = tpu.matmul %0, %1, %cst {dimension_numbers = #tpu.dot_dimension_numbers<[1], [0], [0], [1], [0, 0, 1, 1], [], []>} : vector<8x32xf32>, vector<32x32xf32>, vector<8x32xf32> -> vector<8x32xf32>
    %c0_3 = arith.constant 0 : index
    %c0_4 = arith.constant 0 : index
    %3 = vector.load %arg3[%c0_3, %c0_4] : memref<1x32xf32, #tpu.memory_space<vmem>>, vector<1x32xf32>
    %4 = vector.broadcast %3 : vector<1x32xf32> to vector<8x32xf32>
    %5 = arith.addf %2, %4 : vector<8x32xf32>
    %cst_5 = arith.constant 0.000000e+00 : f32
    %6 = vector.broadcast %cst_5 : f32 to vector<8x32xf32>
    %7 = arith.maximumf %5, %6 : vector<8x32xf32>
    %cst_6 = arith.constant dense<0.000000e+00> : vector<8xf32>
    %8 = vector.multi_reduction <add>, %7, %cst_6 [1] : vector<8x32xf32> to vector<8xf32>
    %9 = vector.shape_cast %8 : vector<8xf32> to vector<8x1xf32>
    %10 = arith.mulf %7, %7 : vector<8x32xf32>
    %cst_7 = arith.constant dense<0.000000e+00> : vector<8xf32>
    %11 = vector.multi_reduction <add>, %10, %cst_7 [1] : vector<8x32xf32> to vector<8xf32>
    %12 = vector.shape_cast %11 : vector<8xf32> to vector<8x1xf32>
    %cst_8 = arith.constant 3.125000e-02 : f32
    %13 = vector.broadcast %cst_8 : f32 to vector<8x1xf32>
    %14 = arith.mulf %9, %13 : vector<8x1xf32>
    %cst_9 = arith.constant 3.125000e-02 : f32
    %15 = vector.broadcast %cst_9 : f32 to vector<8x1xf32>
    %16 = arith.mulf %12, %15 : vector<8x1xf32>
    %17 = arith.mulf %14, %14 : vector<8x1xf32>
    %18 = arith.subf %16, %17 : vector<8x1xf32>
    %cst_10 = arith.constant 9.99999996E-13 : f32
    %19 = vector.broadcast %cst_10 : f32 to vector<8x1xf32>
    %20 = arith.addf %18, %19 : vector<8x1xf32>
    %21 = math.rsqrt %20 : vector<8x1xf32>
    %22 = vector.broadcast %21 : vector<8x1xf32> to vector<8x32xf32>
    %23 = arith.mulf %7, %22 : vector<8x32xf32>
    %24 = arith.mulf %14, %21 : vector<8x1xf32>
    %25 = vector.broadcast %24 : vector<8x1xf32> to vector<8x32xf32>
    %26 = arith.subf %23, %25 : vector<8x32xf32>
    %c0_11 = arith.constant 0 : index
    %c0_12 = arith.constant 0 : index
    %27 = vector.load %arg4[%c0_11, %c0_12] : memref<1x32xf32, #tpu.memory_space<vmem>>, vector<1x32xf32>
    %28 = vector.broadcast %27 : vector<1x32xf32> to vector<8x32xf32>
    %29 = arith.mulf %26, %28 : vector<8x32xf32>
    %c0_13 = arith.constant 0 : index
    %c0_14 = arith.constant 0 : index
    %30 = vector.load %arg5[%c0_13, %c0_14] : memref<1x32xf32, #tpu.memory_space<vmem>>, vector<1x32xf32>
    %31 = vector.broadcast %30 : vector<1x32xf32> to vector<8x32xf32>
    %32 = arith.addf %29, %31 : vector<8x32xf32>
    %c0_15 = arith.constant 0 : index
    %c0_16 = arith.constant 0 : index
    %33 = vector.load %arg6[%c0_15, %c0_16] : memref<32x128xf32, #tpu.memory_space<vmem>>, vector<32x128xf32>
    %cst_17 = arith.constant dense<0.000000e+00> : vector<8x128xf32>
    %34 = tpu.matmul %32, %33, %cst_17 {dimension_numbers = #tpu.dot_dimension_numbers<[1], [0], [0], [1], [0, 0, 1, 1], [], []>} : vector<8x32xf32>, vector<32x128xf32>, vector<8x128xf32> -> vector<8x128xf32>
    %c0_18 = arith.constant 0 : index
    %c0_19 = arith.constant 0 : index
    %35 = vector.load %arg7[%c0_18, %c0_19] : memref<1x128xf32, #tpu.memory_space<vmem>>, vector<1x128xf32>
    %36 = vector.broadcast %35 : vector<1x128xf32> to vector<8x128xf32>
    %37 = arith.addf %34, %36 : vector<8x128xf32>
    %c0_20 = arith.constant 0 : index
    %c0_21 = arith.constant 0 : index
    %38 = vector.load %arg8[%c0_20, %c0_21] : memref<8x128xf32, #tpu.memory_space<vmem>>, vector<8x128xf32>
    tpu.vector_store %arg8[%c0_20, %c0_21], %37 {strides = array<i32>} : memref<8x128xf32, #tpu.memory_space<vmem>>, vector<8x128xf32>,
    return
  }
  func.func @transform_0(%arg0: i32) -> (i32, i32) {
    %c0_i32 = arith.constant 0 : i32
    %c0_i32_0 = arith.constant 0 : i32
    return %arg0, %c0_i32 : i32, i32
  }
  func.func @transform_1(%arg0: i32) -> (i32, i32) {
    %c0_i32 = arith.constant 0 : i32
    %c0_i32_0 = arith.constant 0 : i32
    %c0_i32_1 = arith.constant 0 : i32
    return %c0_i32, %c0_i32_0 : i32, i32
  }
  func.func @transform_2(%arg0: i32) -> (i32, i32) {
    %c0_i32 = arith.constant 0 : i32
    %c0_i32_0 = arith.constant 0 : i32
    %c0_i32_1 = arith.constant 0 : i32
    return %c0_i32, %c0_i32_0 : i32, i32
  }
  func.func @transform_3(%arg0: i32) -> (i32, i32) {
    %c0_i32 = arith.constant 0 : i32
    %c0_i32_0 = arith.constant 0 : i32
    %c0_i32_1 = arith.constant 0 : i32
    return %c0_i32, %c0_i32_0 : i32, i32
  }
  func.func @transform_4(%arg0: i32) -> (i32, i32) {
    %c0_i32 = arith.constant 0 : i32
    %c0_i32_0 = arith.constant 0 : i32
    %c0_i32_1 = arith.constant 0 : i32
    return %c0_i32, %c0_i32_0 : i32, i32
  }
  func.func @transform_5(%arg0: i32) -> (i32, i32) {
    %c0_i32 = arith.constant 0 : i32
    %c0_i32_0 = arith.constant 0 : i32
    %c0_i32_1 = arith.constant 0 : i32
    return %c0_i32, %c0_i32_0 : i32, i32
  }
  func.func @transform_6(%arg0: i32) -> (i32, i32) {
    %c0_i32 = arith.constant 0 : i32
    %c0_i32_0 = arith.constant 0 : i32
    %c0_i32_1 = arith.constant 0 : i32
    return %c0_i32, %c0_i32_0 : i32, i32
  }
  func.func @transform_7(%arg0: i32) -> (i32, i32) {
    %c0_i32 = arith.constant 0 : i32
    %c0_i32_0 = arith.constant 0 : i32
    return %arg0, %c0_i32 : i32, i32
  }
}

</mosaic_0001>

<bundles_post_ra>
// kernel: tpu_custom_call.1
= control target key start
LH: loop header
LB: loop body
LE: loop exit
PB: predicated region body
PF: predicated region fallthrough
CT: control target
= control target key end

     0   :  { %7 = vsyncpa [#allocation3], 0  ;;  %s651_s0 = inlined_call_operand.hbm [shape: f32[8,128], index: 0, kind: input, shape index: {}]   ;;  %s652_s1 = inlined_call_operand.hbm [shape: f32[16,128], index: 1, kind: input, shape index: {}]   ;;  %s653_s2 = inlined_call_operand.hbm [shape: f32[16,128], index: 2, kind: output, shape index: {}]  }
   0x1   :  { %8 = vsyncpa [#allocation6], 0 }
   0x2   :  { %10 = vsyncpa [#allocation6 + $0x1], 0 }
   0x3   :  { %11 = vsyncpa [#allocation4], 0 }
   0x4   :  { %13 = vsyncpa [#allocation4 + $0x1], 0  ;;  %s485_s9 = smov 0   ;;  %s487_s10 = smov 0  }
   0x5   :  { %s489_s11 = smov 0   ;;  %s491_s12 = smov 0  }
   0x6 LB: > { %s506_s13 = sadd.s32 4294967295, %s465_s12   ;;  %s272_s14 = sadd.s32 4294967294, %s465_s12   ;;  %s465_s12 = sphi %s491_s12, %s676_s12   ;;  %s461_s11 = sphi %s489_s11, %s675_s11   ;;  %s457_s10 = sphi %s487_s10, %s674_s10   ;;  %s453_s9 = sphi %s485_s9, %s673_s9  }
   0x7   : > { %p60_p0 = scmp.ne.s32.totalorder %s457_s10, %s453_s9  ;;  %p654_p1 = scmp.eq.s32.totalorder %s506_s13, 0 }
   0x8   : > { %p90_p3 = scmp.eq.s32.totalorder %s272_s14, 1  ;;  %p273_p5 = scmp.ge.s32.totalorder %s465_s12, 1 }
   0x9   : > { %p515_p4 = por %p654_p1, %p60_p0  ;;  %p97_p7 = scmp.lt.s32.totalorder %s465_s12, 3 }
   0xa   : > { %p520_p6 = por %p90_p3, %p60_p0  ;;  %s467_s18 = smov [#allocation2]  }
   0xb   : > { %s658_s15 = scalar_select %p515_p4, 1, 0 }
   0xc   : > { %s659_s16 = scalar_select %p520_p6, 1, 0 }
   0xd   : > { %p525_p8 = pnand %p273_p5, %p97_p7  ;;  %s110_s19 = sshll.u32 %s467_s18, 4  ;;  %s111_s19 = int_to_ptr.vmem [resolvable:$true] %s110_s19 }
   0xe   : > { %s533_s20 = sadd.s32 1, %s465_s12   ;;  %s47_s24 = sadd.s32 1, %s461_s11 }
   0xf   : > { %s660_s17 = scalar_select %p525_p8, 1, 0 }
  0x10   : > { %p294_p10 = pneg %p525_p8  ;;  %s44_s22 = ssub.s32 %s465_s12, %s533_s20 }
  0x11   : > { %p543_p12 = scmp.eq.s32.totalorder %s44_s22, 0  ;;  %p54_p13 = scmp.ne.s32.totalorder %s461_s11, %s457_s10 }
  0x12   : > { %p537_p11 = pnand %p294_p10, %p654_p1  ;;  %s354_s25 = scalar_lea.vmem %s111_s19, 128 }
  0x13   : > { %p355_p3 = scmp.ne.s32.totalorder %s111_s19, %s354_s25  ;;  %p362_p9 = scmp.lt.s32.totalorder %s111_s19, %s111_s19 }
  0x14   : > { %p345_p0 = pneg %p537_p11  ;;  %p363_p2 = scmp.lt.s32.totalorder %s354_s25, %s354_s25 }
  0x16   : > { %p357_p5 = pnand %p355_p3, %p345_p0  ;;  %p364_p10 = por %p363_p2, %p362_p9 }
  0x18   : > { %p358_p7 = pneg %p357_p5 }
  0x1a   : > { %p365_p1 = pnand %p364_p10, %p358_p7 }
  0x1c   : > { %368 = shalt.err (!%p365_p1)
}
  0x1d   : > { %297 = dma.hbm_to_vmem [thread:$0]  (!%p537_p11), %s651_s0, 128, %s111_s19, [#allocation3]  }
  0x1e   : > { %s560_s28 = scalar_select %p543_p12, %s461_s11, %s47_s24  }
  0x1f   : > { %p55_p1 = scmp.eq.s32.totalorder %s465_s12, 0  ;;  %p663_p2 = scmp.eq.s32.totalorder %s506_s13, 1 }
  0x20   : > { %p307_p0 = scmp.lt.s32.totalorder %s465_s12, 2  ;;  %s121_s30 = sand.u32 1, %s461_s11  }
  0x21   : > { %p568_p9 = por %p663_p2, %p54_p13  ;;  %p56_p3 = por %p55_p1, %p54_p13 }
  0x22   : > { %s276_s3 = sshll.u32 %s121_s30, 3  ;;  %s277_s4 = sshll.u32 %s465_s12, 7 }
  0x23   : > { %s664_s29 = scalar_select %p568_p9, 1, 0 }
  0x24   : > { %s581_s7 = scalar_lea.hbm %s652_s1, %s277_s4  ;;  %s125_s8 = scalar_lea.vmem [#allocation5], %s276_s3 }
  0x25   : > { %s132_s14 = sshll.u32 %s125_s8, 4  ;;  %p583_p11 = pnand %p307_p0, %p56_p3  ;;  %s133_s14 = int_to_ptr.vmem [resolvable:$true] %s132_s14 }
  0x26   : > { %s122_s19 = scalar_lea.sflag [#allocation6], %s121_s30  ;;  %s369_s21 = scalar_lea.hbm %s581_s7, 128 }
  0x27   : > { %p370_p12 = scmp.ne.s32.totalorder %s581_s7, %s369_s21  ;;  %p371_p13 = pneg %p583_p11 }
  0x28   : > { %s374_s24 = scalar_lea.hbm %s652_s1, 256  ;;  %p375_p10 = scmp.lt.s32.totalorder %s581_s7, %s652_s1 }
  0x29   : > { %p372_p5 = pnand %p371_p13, %p370_p12  ;;  %p376_p1 = scmp.lt.s32.totalorder %s374_s24, %s369_s21 }
  0x2b   : > { %p373_p7 = pneg %p372_p5  ;;  %p377_p2 = por %p376_p1, %p375_p10 }
  0x2d   : > { %p378_p0 = pnand %p377_p2, %p373_p7 }
  0x2f   : > { %381 = shalt.err (!%p378_p0)
}
  0x30   : > { %s382_s27 = scalar_lea.vmem %s133_s14, 128  ;;  %s468_s30 = smov [#allocation5]  }
  0x31   : > { %p383_p3 = scmp.ne.s32.totalorder %s133_s14, %s382_s27  ;;  %s387_s3 = sshll.u32 %s468_s30, 4  ;;  %s388_s3 = int_to_ptr.vmem [resolvable:$false] %s387_s3 }
  0x32   : > { %s389_s4 = scalar_lea.vmem %s388_s3, 256  ;;  %p390_p12 = scmp.lt.s32.totalorder %s133_s14, %s388_s3 }
  0x33   : > { %p385_p6 = pnand %p383_p3, %p371_p13  ;;  %p391_p5 = scmp.lt.s32.totalorder %s389_s4, %s382_s27 }
  0x35   : > { %p386_p9 = pneg %p385_p6  ;;  %p392_p4 = por %p391_p5, %p390_p12 }
  0x37   : > { %p393_p8 = pnand %p392_p4, %p386_p9 }
  0x39   : > { %396 = shalt.err (!%p393_p8)
}
  0x3a   : > { %301 = dma.hbm_to_vmem [thread:$0]  (!%p583_p11), %s581_s7, 128, %s133_s14, %s122_s19  }
  0x3b   : > { %p666_p7 = scmp.ne.s32.totalorder %s660_s17, 0 }
  0x3c   : > { %p667_p10 = scmp.eq.s32.totalorder (!%p666_p7), %s506_s13, 0 }
  0x3d   : > { %141 = sbr.rel (%p666_p7) target bundleno = 96 (0x60), region = 28 }
  0x42   : > { %440 = dma.done.wait (%p667_p10), [#allocation3], 128   ;;  %p668_p6 = pmov %p667_p10 }
  0x43   : > { %s608_s5 = sand.u32 1, %s457_s10   ;;  %p669_p4 = scmp.ne.s32.totalorder %s658_s15, 0 }
  0x44   : > { %442 = vsyncadd (%p668_p6), [#allocation3], 4294967168  ;;  %s280_s6 = sshll.u32 %s608_s5, 3  ;;  %s148_s8 = scalar_lea.sflag [#allocation6], %s608_s5 }
  0x45   : > { %s151_s18 = scalar_lea.vmem [#allocation5], %s280_s6 }
  0x46   : > { %444 = dma.done.wait (%p669_p4), %s148_s8, 128  }
  0x47   : > { %446 = vsyncadd (%p669_p4), %s148_s8, 4294967168  ;;  %s171_s17 = scalar_lea.vmem [#allocation7], %s280_s6  ;;  %s283_s14 = sshll.u32 %s506_s13, 7  ;;  %v172_v0 = vld [vmem:[%s151_s18] sm:$0xff]  ;;  %v173_v1 = vld [vmem:[#allocation2] sm:$0xff] }
  0x48   : > { %s190_s7 = sshll.u32 %s171_s17, 4  ;;  %v174_v2 = vadd.f32 %v173_v1, %v172_v0  ;;  %s188_s22 = scalar_lea.hbm %s653_s2, %s283_s14  ;;  %s191_s7 = int_to_ptr.vmem [resolvable:$true] %s190_s7 }
  0x49   : > { %s177_s23 = scalar_lea.sflag [#allocation4], %s608_s5  ;;  %s397_s24 = scalar_lea.vmem %s191_s7, 128 }
  0x4a   : > { %175 = vst [vmem:[%s171_s17] sm:$0xff] %v174_v2  ;;  %p398_p8 = scmp.ne.s32.totalorder %s191_s7, %s397_s24  ;;  %p670_p9 = scmp.ne.s32.totalorder %s664_s29, 0 }
  0x4b   : > { %s469_s15 = smov [#allocation7]  }
  0x4c   : > { %p399_p11 = pnand %p398_p8, %p670_p9  ;;  %s401_s25 = sshll.u32 %s469_s15, 4  ;;  %s402_s25 = int_to_ptr.vmem [resolvable:$false] %s401_s25 }
  0x4d   : > { %s403_s26 = scalar_lea.vmem %s402_s25, 256  ;;  %p404_p1 = scmp.lt.s32.totalorder %s191_s7, %s402_s25 }
  0x4e   : > { %p400_p13 = pneg %p399_p11  ;;  %p405_p2 = scmp.lt.s32.totalorder %s403_s26, %s397_s24 }
  0x50   : > { %p406_p0 = por %p405_p2, %p404_p1 }
  0x52   : > { %p407_p3 = pnand %p406_p0, %p400_p13 }
  0x54   : > { %410 = shalt.err (!%p407_p3)
}
  0x55   : > { %s411_s13 = scalar_lea.hbm %s188_s22, 128  ;;  %s415_s3 = scalar_lea.hbm %s653_s2, 256 }
  0x56   : > { %p412_p12 = scmp.ne.s32.totalorder %s188_s22, %s411_s13  ;;  %p416_p10 = scmp.lt.s32.totalorder %s188_s22, %s653_s2 }
  0x57   : > { %p417_p6 = scmp.lt.s32.totalorder %s415_s3, %s411_s13 }
  0x58   : > { %p413_p5 = pnand %p412_p12, %p670_p9 }
  0x59   : > { %p418_p4 = por %p417_p6, %p416_p10 }
  0x5a   : > { %p414_p7 = pneg %p413_p5 }
  0x5c   : > { %p419_p8 = pnand %p418_p4, %p414_p7 }
  0x5e   : > { %422 = shalt.err (!%p419_p8)
}
  0x5f   : > { %292 = dma.vmem_to_hbm [thread:$0]  (%p670_p9), %s191_s7, 128, %s188_s22, %s177_s23  }
  0x60 PF: > { %s202_s6 = sand.u32 1, %s453_s9   ;;  %p671_p11 = scmp.ne.s32.totalorder %s659_s16, 0 }
  0x61   : > { %p672_p13 = scmp.ge.s32.totalorder %s465_s12, 2  ;;  %s203_s8 = scalar_lea.sflag [#allocation4], %s202_s6 }
  0x63   : > { %p303_p1 = pnand %p672_p13, %p671_p11 }
  0x65   : > { %p304_p2 = pneg %p303_p1 }
  0x67   : > { %448 = dma.done.wait (%p304_p2), %s203_s8, 128  }
  0x68   : > { %450 = vsyncadd (%p304_p2), %s203_s8, 4294967168  ;;  %p16_p0 = scmp.ge.s32.totalorder %s533_s20, 4   ;;  %s673_s9 = smov %s457_s10 }
  0x69   : > { %s674_s10 = smov %s461_s11  ;;  %s675_s11 = smov %s560_s28 }
  0x6a   : > { %s676_s12 = smov %s533_s20  ;;  %18 = sbr.rel (!%p16_p0) target bundleno = 6 (0x6), region = 78 }
  0x6f   :  { %208 = vsyncpa [#allocation3], 1 }
  0x70   :  { %210 = vsyncpa [#allocation3 + $0x1], 1 }
  0x71   :  { %211 = vsyncpa [#allocation6], 1 }
  0x72   :  { %213 = vsyncpa [#allocation6 + $0x1], 1 }
  0x73   :  { %214 = vsyncpa [#allocation4], 1 }
  0x74   :  { %216 = vsyncpa [#allocation4 + $0x1], 1 }

// kernel: tpu_custom_call.1
= control target key start
LH: loop header
LB: loop body
LE: loop exit
PB: predicated region body
PF: predicated region fallthrough
CT: control target
= control target key end

     0   :  { %s1146_s0 = inlined_call_operand.hbm [shape: f32[16,32], index: 0, kind: input, shape index: {}]   ;;  %s1147_s1 = inlined_call_operand.hbm [shape: f32[32,32], index: 1, kind: input, shape index: {}]   ;;  %s1148_s2 = inlined_call_operand.vmem [shape: f32[1,32], index: 2, kind: input, shape index: {}]   ;;  %s1149_s3 = inlined_call_operand.vmem [shape: f32[1,32], index: 3, kind: input, shape index: {}]   ;;  %s1150_s4 = inlined_call_operand.vmem [shape: f32[1,32], index: 4, kind: input, shape index: {}]   ;;  %s1151_s5 = inlined_call_operand.hbm [shape: f32[32,128], index: 5, kind: input, shape index: {}]   ;;  %s1152_s6 = inlined_call_operand.vmem [shape: f32[1,128], index: 6, kind: input, shape index: {}]   ;;  %s1153_s7 = inlined_call_operand.hbm [shape: f32[16,128], index: 7, kind: output, shape index: {}]  }
   0x1   :  { %1158 = sst [smem:[#allocation12_spill]] %s1147_s1 }
   0x2   :  { %1159 = sst [smem:[#allocation13_spill]] %s1151_s5 }
   0x3   :  { %12 = vsyncpa [#allocation3], 0 }
   0x4   :  { %14 = vsyncpa [#allocation3 + $0x1], 0 }
   0x5   :  { %15 = vsyncpa [#allocation6], 0 }
   0x6   :  { %16 = vsyncpa [#allocation4], 0 }
   0x7   :  { %18 = vsyncpa [#allocation4 + $0x1], 0  ;;  %s955_s24 = smov 0   ;;  %s957_s25 = smov 0  }
   0x8   :  { %s959_s26 = smov 0   ;;  %s961_s27 = smov 0  }
   0x9 LB: > { %s976_s28 = sadd.s32 4294967295, %s905_s27   ;;  %s630_s29 = sadd.s32 4294967294, %s905_s27   ;;  %s905_s27 = sphi %s961_s27, %s1179_s27   ;;  %s901_s26 = sphi %s959_s26, %s1178_s26   ;;  %s897_s25 = sphi %s957_s25, %s1177_s25   ;;  %s893_s24 = sphi %s955_s24, %s1176_s24  }
   0xa   : > { %p44_p0 = scmp.ne.s32.totalorder %s897_s25, %s893_s24  ;;  %p1154_p1 = scmp.eq.s32.totalorder %s976_s28, 0 }
   0xb   : > { %p200_p3 = scmp.eq.s32.totalorder %s630_s29, 1  ;;  %p631_p5 = scmp.ge.s32.totalorder %s905_s27, 1 }
   0xc   : > { %p985_p4 = por %p1154_p1, %p44_p0  ;;  %p207_p7 = scmp.lt.s32.totalorder %s905_s27, 3 }
   0xd   : > { %p990_p6 = por %p200_p3, %p44_p0  ;;  %s907_s10 = smov [#allocation5]  }
   0xe   : > { %s1160_s30 = scalar_select %p985_p4, 1, 0 }
   0xf   : > { %s1161_s8 = scalar_select %p990_p6, 1, 0 }
  0x10   : > { %p995_p8 = pnand %p631_p5, %p207_p7  ;;  %s219_s11 = sshll.u32 %s907_s10, 4  ;;  %s220_s11 = int_to_ptr.vmem [resolvable:$true] %s219_s11 }
  0x11   : > { %s908_s13 = smov [#allocation7]   ;;  %s768_s15 = scalar_lea.vmem %s220_s11, 512 }
  0x12   : > { %s1162_s9 = scalar_select %p995_p8, 1, 0 }
  0x13   : > { %p696_p9 = pneg %p995_p8  ;;  %s241_s14 = sshll.u32 %s908_s13, 4  ;;  %s242_s14 = int_to_ptr.vmem [resolvable:$true] %s241_s14 }
  0x14   : > { %p769_p13 = scmp.ne.s32.totalorder %s220_s11, %s768_s15  ;;  %p776_p5 = scmp.lt.s32.totalorder %s220_s11, %s220_s11 }
  0x15   : > { %p1004_p11 = pnand %p696_p9, %p1154_p1  ;;  %p777_p7 = scmp.lt.s32.totalorder %s768_s15, %s768_s15 }
  0x17   : > { %p759_p12 = pneg %p1004_p11  ;;  %p778_p10 = por %p777_p7, %p776_p5 }
  0x19   : > { %p771_p0 = pnand %p769_p13, %p759_p12 }
  0x1b   : > { %p772_p3 = pneg %p771_p0 }
  0x1d   : > { %p779_p9 = pnand %p778_p10, %p772_p3 }
  0x1f   : > { %782 = shalt.err (!%p779_p9)
}
  0x20   : > { %s909_s16 = smov 128   ;;  %s910_s17 = smov 8  }
  0x21   : > { %s1164_s1 = sld [smem:[#allocation12_spill]]  ;;  %s794_s20 = scalar_lea.vmem %s242_s14, 512 }
  0x22   : > { %p795_p1 = scmp.ne.s32.totalorder %s242_s14, %s794_s20  ;;  %p802_p2 = scmp.lt.s32.totalorder %s242_s14, %s242_s14 }
  0x23   : > { %p803_p6 = scmp.lt.s32.totalorder %s794_s20, %s794_s20 }
  0x24   : > { %p797_p13 = pnand %p795_p1, %p759_p12 }
  0x25   : > { %p804_p5 = por %p803_p6, %p802_p2 }
  0x26   : > { %p798_p0 = pneg %p797_p13 }
  0x27   : > { %699 = dma.hbm_to_vmem [thread:$0]  (!%p1004_p11), %s1164_s1, 512, %s220_s11, [#allocation6], %s909_s16, %s909_s16, %s910_s17  }
  0x28   : > { %p805_p10 = pnand %p804_p5, %p798_p0 }
  0x2a   : > { %808 = shalt.err (!%p805_p10)
}
  0x2b   : > { %s1165_s5 = sld [smem:[#allocation13_spill]]  ;;  %s1027_s23 = sadd.s32 1, %s905_s27  }
  0x2c   : > { %s31_s29 = sadd.s32 1, %s901_s26  ;;  %s28_s10 = ssub.s32 %s905_s27, %s1027_s23 }
  0x2d   : > { %p38_p1 = scmp.ne.s32.totalorder %s901_s26, %s897_s25  ;;  %p29_p2 = scmp.eq.s32.totalorder %s28_s10, 0 }
  0x2e   : > { %p39_p6 = scmp.eq.s32.totalorder %s905_s27, 0  ;;  %p1166_p12 = scmp.eq.s32.totalorder %s976_s28, 1 }
  0x2f   : > { %p713_p7 = scmp.lt.s32.totalorder %s905_s27, 2  ;;  %s258_s13 = sand.u32 1, %s901_s26  }
  0x30   : > { %p1037_p3 = por %p1166_p12, %p38_p1  ;;  %p40_p9 = por %p39_p6, %p38_p1 }
  0x31   : > { %702 = dma.hbm_to_vmem [thread:$0]  (!%p1004_p11), %s1165_s5, 512, %s242_s14, [#allocation6], %s909_s16, %s909_s16, %s910_s17  }
  0x32   : > { %s1167_s11 = scalar_select %p1037_p3, 1, 0 }
  0x33   : > { %s1043_s12 = scalar_select %p29_p2, %s901_s26, %s31_s29  }
  0x34   : > { %s635_s15 = sshll.u32 %s258_s13, 3  ;;  %s636_s14 = sshll.u32 %s905_s27, 7 }
  0x35   : > { %s1050_s18 = scalar_lea.hbm %s1146_s0, %s636_s14  ;;  %s262_s19 = scalar_lea.vmem [#allocation2], %s635_s15 }
  0x36   : > { %s269_s20 = sshll.u32 %s262_s19, 4  ;;  %p1052_p11 = pnand %p713_p7, %p40_p9  ;;  %s270_s20 = int_to_ptr.vmem [resolvable:$true] %s269_s20 }
  0x37   : > { %s259_s22 = scalar_lea.sflag [#allocation3], %s258_s13  ;;  %s809_s29 = scalar_lea.hbm %s1050_s18, 128 }
  0x38   : > { %p810_p13 = scmp.ne.s32.totalorder %s1050_s18, %s809_s29  ;;  %p811_p0 = pneg %p1052_p11 }
  0x39   : > { %s814_s16 = scalar_lea.hbm %s1146_s0, 256  ;;  %p815_p1 = scmp.lt.s32.totalorder %s1050_s18, %s1146_s0 }
  0x3a   : > { %p812_p5 = pnand %p811_p0, %p810_p13  ;;  %p816_p2 = scmp.lt.s32.totalorder %s814_s16, %s809_s29 }
  0x3c   : > { %p813_p10 = pneg %p812_p5  ;;  %p817_p6 = por %p816_p2, %p815_p1 }
  0x3e   : > { %p818_p12 = pnand %p817_p6, %p813_p10 }
  0x40   : > { %821 = shalt.err (!%p818_p12)
}
  0x41   : > { %s822_s19 = scalar_lea.vmem %s270_s20, 128  ;;  %s911_s13 = smov [#allocation2]  }
  0x42   : > { %p823_p7 = scmp.ne.s32.totalorder %s270_s20, %s822_s19  ;;  %s827_s1 = sshll.u32 %s911_s13, 4  ;;  %s828_s1 = int_to_ptr.vmem [resolvable:$false] %s827_s1 }
  0x43   : > { %s829_s5 = scalar_lea.vmem %s828_s1, 256  ;;  %p830_p13 = scmp.lt.s32.totalorder %s270_s20, %s828_s1 }
  0x44   : > { %p825_p9 = pnand %p823_p7, %p811_p0  ;;  %p831_p5 = scmp.lt.s32.totalorder %s829_s5, %s822_s19 }
  0x46   : > { %p826_p3 = pneg %p825_p9  ;;  %p832_p4 = por %p831_p5, %p830_p13 }
  0x48   : > { %p833_p8 = pnand %p832_p4, %p826_p3 }
  0x4a   : > { %836 = shalt.err (!%p833_p8)
}
  0x4b   : > { %706 = dma.hbm_to_vmem [thread:$0]  (!%p1052_p11), %s1050_s18, 128, %s270_s20, %s259_s22  }
  0x4c   : > { %p1169_p10 = scmp.ne.s32.totalorder %s1162_s9, 0 }
  0x4d   : > { %s1073_s29 = sand.u32 (!%p1169_p10), 1, %s897_s25   ;;  %p1170_p4 = scmp.ne.s32.totalorder (!%p1169_p10), %s1160_s30, 0 }
  0x4e   : > { %278 = sbr.rel (%p1169_p10) target bundleno = 673 (0x2a1), region = 48  ;;  %s638_s10 = sshll.u32 (!%p1169_p10), %s1073_s29, 3 }
  0x4f   : > { %s281_s1 = scalar_lea.sflag (!%p1169_p10), [#allocation3], %s1073_s29  ;;  %s284_s5 = scalar_lea.vmem (!%p1169_p10), [#allocation2], %s638_s10 }
  0x53   : > { %880 = dma.done.wait (%p1170_p4), %s281_s1, 128  }
  0x54   : > { %882 = vsyncadd (%p1170_p4), %s281_s1, 4294967168  ;;  %p1171_p8 = scmp.eq.s32.totalorder %s976_s28, 0 }
  0x56   : > { %884 = dma.done.wait (%p1171_p8), [#allocation6], 1024   ;;  %p1172_p3 = pmov %p1171_p8 }
  0x57   : > { %v912_v0 = vmov 0.0   ;;  %vm913_vm0 = vmmov 0   ;;  %v327_v1 = vld [vmem:[#allocation5 + $0x18] sm:$0xff]  ;;  %v326_v2 = vld [vmem:[#allocation5 + $0x10] sm:$0xff]  ;;  %v325_v3 = vld [vmem:[#allocation5 + $0x8] sm:$0xff]  ;;  %vm335_vm1 = vcmask 261120  }
  0x58   : > { %886 = vsyncadd (%p1172_p3), [#allocation6], 4294966272  ;;  %662 = vmatprep.subr.mxu0 %v912_v0  ;;  %670 = vmatprep.mubr.msk.f32.mxu0 %vm913_vm0, %v912_v0  ;;  %v324_v4 = vld [vmem:[#allocation5] sm:$0xff]  ;;  %v323_v5 = vld [vmem:[%s284_s5] sm:$0xff]  ;;  %s649_s17 = sshll.u32 %s976_s28, 7  ;;  %s322_s15 = scalar_lea.vmem [#allocation8], %s638_s10 }
  0x59   : > { %673 = vmatprep.subr.mxu1 %v912_v0  ;;  %681 = vmatprep.mubr.msk.f32.mxu1 %vm913_vm0, %v912_v0  ;;  %v642_v6 = vld [vmem:[%s1148_s2] ss:$0 sm:$0xff]  ;;  %v445_v14 = vld [vmem:[#allocation7 + $0x18] sm:$0xff]  ;;  %v443_v16 = vld [vmem:[#allocation7 + $0x8] sm:$0xff]  ;;  %s541_s19 = sshll.u32 %s322_s15, 4  ;;  %s1109_s5 = scalar_lea.hbm %s1153_s7, %s649_s17  ;;  %s542_s19 = int_to_ptr.vmem [resolvable:$true] %s541_s19 }
  0x5a   : > { %663 = vmatpush3.msra.mxu0 %v327_v1  ;;  %v444_v15 = vld [vmem:[#allocation7 + $0x10] sm:$0xff]  ;;  %674 = vmatpush3.msra.mxu1 %v445_v14  ;;  %v442_v17 = vld [vmem:[#allocation7] sm:$0xff]  ;;  %s528_s30 = scalar_lea.sflag [#allocation4], %s1073_s29  ;;  %s837_s9 = scalar_lea.vmem %s542_s19, 128 }
  0x5b   : > { %664 = vmatprep.subr.mxu0 %v912_v0  ;;  %675 = vmatprep.subr.mxu1 %v912_v0  ;;  %v644_v28 = vld [vmem:[%s1149_s3] ss:$0 sm:$0xff]  ;;  %p838_p11 = scmp.ne.s32.totalorder %s542_s19, %s837_s9  ;;  %p1173_p0 = scmp.ne.s32.totalorder %s1167_s11, 0 }
  0x5c   : > { %665 = vmatpush3.msra.mxu0 %v326_v2  ;;  %676 = vmatpush3.msra.mxu1 %v444_v15  ;;  %v645_v30 = vld [vmem:[%s1150_s4] ss:$0 sm:$0xff]  ;;  %s914_s28 = smov [#allocation8]  }
  0x5d   : > { %666 = vmatprep.subr.mxu0 %v912_v0  ;;  %677 = vmatprep.subr.mxu1 %v912_v0  ;;  %v646_v33 = vld [vmem:[%s1152_s6] ss:$0 sm:$0xff]  ;;  %p839_p1 = pnand %p838_p11, %p1173_p0  ;;  %s841_s18 = sshll.u32 %s914_s28, 4  ;;  %s842_s18 = int_to_ptr.vmem [resolvable:$false] %s841_s18 }
  0x5e   : > { %667 = vmatpush3.msra.mxu0 %v325_v3  ;;  %678 = vmatpush3.msra.mxu1 %v443_v16  ;;  %s843_s10 = scalar_lea.vmem %s842_s18, 256  ;;  %p844_p6 = scmp.lt.s32.totalorder %s542_s19, %s842_s18 }
  0x5f   : > { %668 = vmatprep.subr.mxu0 %v912_v0  ;;  %679 = vmatprep.subr.mxu1 %v912_v0  ;;  %p840_p2 = pneg %p839_p1  ;;  %p845_p12 = scmp.lt.s32.totalorder %s843_s10, %s837_s9 }
  0x60   : > { %669 = vmatpush3.msra.mxu0 %v324_v4  ;;  %680 = vmatpush3.msra.mxu1 %v442_v17 }
  0x61   : > { %671 = vmatmul.mubr.msk.f32.vlgmr.msra.gmra.mxu0 %vm335_vm1, %v323_v5  ;;  %p846_p7 = por %p845_p12, %p844_p6 }
  0x63   : > { %p847_p9 = pnand %p846_p7, %p840_p2 }
 0x121   : > { %v405_v7 = vpop.f32.mrf.mxu0 }
 0x122   : > { %v406_v8 = vadd.f32 %v642_v6, %v405_v7 }
 0x123   : > { %v672_v9 = vpop.f32.mrf.mxu0 }
 0x124   : > { %v409_v10 = vmax.f32 %v406_v8, 0.0 }
 0x126   : > { %v410_v11 = vsel %vm335_vm1, %v409_v10, 0.0  ;;  %v413_v12 = vmul.f32 %v409_v10, %v409_v10 }
 0x127   : > { %411 = vadd.xlane.f32.xlu0 %v410_v11 }
 0x128   : > { %v414_v13 = vsel %vm335_vm1, %v413_v12, 0.0 }
 0x12b   : > { %415 = vadd.xlane.f32.xlu0 %v414_v13 }
 0x1b0   : > { %v412_v18 = vpop.xlane.xlu0 %411 }
 0x1b1   : > { %v417_v19 = vmul.f32 0.03125, %v412_v18 }
 0x1b3   : > { %v419_v21 = vmul.f32 %v417_v19, %v417_v19 }
 0x1b4   : > { %v416_v20 = vpop.xlane.xlu0 %415 }
 0x1b5   : > { %v418_v22 = vmul.f32 0.03125, %v416_v20 }
 0x1b7   : > { %v420_v23 = vsub.f32 %v418_v22, %v419_v21 }
 0x1b9   : > { %v421_v24 = vadd.f32 1e-12, %v420_v23 }
 0x1bb   : > { %755 = vrsqrt.f32 %v421_v24 }
 0x1c8   : > { %v756_v25 = vpop.eup %755 }
 0x1c9   : > { %v423_v26 = vmul.f32 %v756_v25, %v409_v10  ;;  %v424_v27 = vmul.f32 %v756_v25, %v417_v19 }
 0x1cb   : > { %v425_v29 = vsub.f32 %v423_v26, %v424_v27 }
 0x1cd   : > { %v433_v31 = vmul.f32 %v644_v28, %v425_v29 }
 0x1cf   : > { %v441_v32 = vadd.f32 %v645_v30, %v433_v31 }
 0x1d1   : > { %682 = vmatmul.mubr.msk.f32.vlgmr.msra.gmra.mxu1 %vm335_vm1, %v441_v32 }
 0x291   : > { %v522_v34 = vpop.f32.mrf.mxu1 }
 0x292   : > { %v523_v35 = vadd.f32 %v646_v33, %v522_v34 }
 0x293   : > { %v683_v36 = vpop.f32.mrf.mxu1 }
 0x294   : > { %526 = vst [vmem:[%s322_s15] sm:$0xff] %v523_v35 }
 0x295   : > { %850 = shalt.err (!%p847_p9)
}
 0x296   : > { %s851_s20 = scalar_lea.hbm %s1109_s5, 128  ;;  %s855_s22 = scalar_lea.hbm %s1153_s7, 256 }
 0x297   : > { %p852_p13 = scmp.ne.s32.totalorder %s1109_s5, %s851_s20  ;;  %p856_p4 = scmp.lt.s32.totalorder %s1109_s5, %s1153_s7 }
 0x298   : > { %p857_p8 = scmp.lt.s32.totalorder %s855_s22, %s851_s20 }
 0x299   : > { %p853_p5 = pnand %p852_p13, %p1173_p0 }
 0x29a   : > { %p858_p3 = por %p857_p8, %p856_p4 }
 0x29b   : > { %p854_p10 = pneg %p853_p5 }
 0x29d   : > { %p859_p11 = pnand %p858_p3, %p854_p10 }
 0x29f   : > { %862 = shalt.err (!%p859_p11)
}
 0x2a0   : > { %694 = dma.vmem_to_hbm [thread:$0]  (%p1173_p0), %s542_s19, 128, %s1109_s5, %s528_s30  }
 0x2a1 PF: > { %s553_s17 = sand.u32 1, %s893_s24   ;;  %p1174_p1 = scmp.ne.s32.totalorder %s1161_s8, 0 }
 0x2a2   : > { %p1175_p2 = scmp.ge.s32.totalorder %s905_s27, 2  ;;  %s554_s15 = scalar_lea.sflag [#allocation4], %s553_s17 }
 0x2a4   : > { %p708_p6 = pnand %p1175_p2, %p1174_p1 }
 0x2a6   : > { %p709_p12 = pneg %p708_p6 }
 0x2a8   : > { %888 = dma.done.wait (%p709_p12), %s554_s15, 128  }
 0x2a9   : > { %890 = vsyncadd (%p709_p12), %s554_s15, 4294967168  ;;  %p21_p7 = scmp.ge.s32.totalorder %s1027_s23, 4   ;;  %s1176_s24 = smov %s897_s25 }
 0x2aa   : > { %s1177_s25 = smov %s901_s26  ;;  %s1178_s26 = smov %s1043_s12 }
 0x2ab   : > { %s1179_s27 = smov %s1027_s23  ;;  %23 = sbr.rel (!%p21_p7) target bundleno = 9 (0x9), region = 101 }
 0x2b0   :  { %559 = vsyncpa [#allocation3], 1 }
 0x2b1   :  { %561 = vsyncpa [#allocation3 + $0x1], 1 }
 0x2b2   :  { %562 = vsyncpa [#allocation6], 1 }
 0x2b3   :  { %563 = vsyncpa [#allocation4], 1 }
 0x2b4   :  { %565 = vsyncpa [#allocation4 + $0x1], 1 }

</bundles_post_ra>
